<compile_context>
chip_gen: v7x
topology: tpu7x:2x2x1
jax: 0.10.0
libtpu: 0.0.40
codegen_flags: <defaults>
</compile_context>

<pallas_src>
import functools

import jax
import jax.numpy as jnp
from jax.experimental import pallas as pl
from jax.experimental.pallas import tpu as pltpu

NZ = 8        # nz
NDF = 16      # ndf
POWER = 6     # power
BATCH = 8     # example batch size
LANE = 128
TB_MAX = 512  # batch-tile (lane) size cap; small enough for v7x's 64 MiB VMEM
BN_EPS = 1e-5


def _leaky_relu(v, slope=0.1):
    return jnp.where(v > 0, v, slope * v)


def _round_up(n, m):
    return ((n + m - 1) // m) * m


def f_mnist_kernel(power,
                   xt_ref,
                   w1_ref, b1_ref,
                   w2_ref, b2_ref,
                   w3_ref, b3_ref,
                   w4_ref, b4_ref,
                   o_ref):
    """One batch tile; batch mapped to the 128-lane axis.

    xt_ref : (nz, TB)  f32   -- x transposed
    wN_ref : (out, in) bf16  -- BN folded into W/b; layer-1 x**0 block folded into b1
    bN_ref : (out, 1)  f32
    o_ref  : (1, TB)   f32   -- lane-dense sigmoid output
    """
    x = xt_ref[...]                                            # (nz, TB) f32

    # Powers x**1 .. x**(power-1), stacked along sublanes (x**0 folded into b1).
    pows = [x]
    xp = x
    for _ in range(power - 2):
        xp = xp * x
        pows.append(xp)
    feat = jnp.concatenate(pows, axis=0).astype(jnp.bfloat16)  # (nz*(power-1), TB)

    # Layer 1: Linear + folded BN, then LeakyReLU.  h^T = W @ feat^T + b.
    h = jnp.dot(w1_ref[...], feat,
                preferred_element_type=jnp.float32) + b1_ref[...]
    h = _leaky_relu(h)
    # Dropout(p=0.2): identity in eval mode.

    # Layer 2
    h = jnp.dot(w2_ref[...], h.astype(jnp.bfloat16),
                preferred_element_type=jnp.float32) + b2_ref[...]
    h = _leaky_relu(h)

    # Layer 3
    h = jnp.dot(w3_ref[...], h.astype(jnp.bfloat16),
                preferred_element_type=jnp.float32) + b3_ref[...]
    h = _leaky_relu(h)

    # Layer 4 + Sigmoid
    h = jnp.dot(w4_ref[...], h.astype(jnp.bfloat16),
                preferred_element_type=jnp.float32) + b4_ref[...]
    o_ref[...] = jax.nn.sigmoid(h).astype(o_ref.dtype)


def init_params(key, nz=NZ, ndf=NDF, power=POWER):
    """PyTorch-layout params: Linear W is (out, in), b is (out,);
    BatchNorm1d gamma=1, beta=0, running_mean=0, running_var=1 (fresh init)."""
    dims = [nz * power, ndf * 4, ndf * 2, ndf, 1]
    params = {}
    keys = jax.random.split(key, 8)
    for li in range(4):
        fan_in, fan_out = dims[li], dims[li + 1]
        bound = 1.0 / jnp.sqrt(jnp.float32(fan_in))
        params[f"w{li + 1}"] = jax.random.uniform(
            keys[2 * li], (fan_out, fan_in), jnp.float32, -bound, bound)
        params[f"b{li + 1}"] = jax.random.uniform(
            keys[2 * li + 1], (fan_out,), jnp.float32, -bound, bound)
        if li < 3:
            params[f"gamma{li + 1}"] = jnp.ones((fan_out,), jnp.float32)
            params[f"beta{li + 1}"] = jnp.zeros((fan_out,), jnp.float32)
            params[f"mean{li + 1}"] = jnp.zeros((fan_out,), jnp.float32)
            params[f"var{li + 1}"] = jnp.ones((fan_out,), jnp.float32)
    return params


def fold_params(params, nz=NZ, eps=BN_EPS):
    """One-time wrapper-side folding: BN -> (W, b); x**0 block of W1 -> b1.
    Weights stored bf16 (MXU-native), biases f32."""
    folded = {}
    for li in range(1, 5):
        w = params[f"w{li}"]
        b = params[f"b{li}"]
        if li < 4:
            scale = params[f"gamma{li}"] / jnp.sqrt(params[f"var{li}"] + eps)
            shift = params[f"beta{li}"] - params[f"mean{li}"] * scale
            w = w * scale[:, None]
            b = b * scale + shift
        if li == 1:
            # x**0 == 1 for every sample: fold that weight block into the bias.
            b = b + w[:, :nz].sum(axis=1)
            w = w[:, nz:]
        folded[f"w{li}"] = w.astype(jnp.bfloat16)
        folded[f"b{li}"] = b[:, None].astype(jnp.float32)
    return folded


def f_mnist_forward(x, folded, nz=NZ, power=POWER, tb_max=TB_MAX):
    B = x.shape[0]
    tb = min(tb_max, _round_up(B, LANE))
    Bp = _round_up(B, tb)

    # Transpose + zero-pad batch to a multiple of the lane tile.
    xt = jnp.zeros((nz, Bp), jnp.float32).at[:, :B].set(x.T.astype(jnp.float32))

    weight_args = (folded["w1"], folded["b1"],
                   folded["w2"], folded["b2"],
                   folded["w3"], folded["b3"],
                   folded["w4"], folded["b4"])

    const_map = lambda i: (0, 0)                       # weights stay VMEM-resident
    weight_specs = [pl.BlockSpec(a.shape, const_map) for a in weight_args]

    flops = 2 * Bp * sum(int(folded[f"w{l}"].size) for l in range(1, 5))
    bytes_accessed = (xt.size * 4 + Bp * 4
                      + sum(int(a.size) * a.dtype.itemsize for a in weight_args))
    cost = pl.CostEstimate(flops=flops, transcendentals=Bp,
                           bytes_accessed=int(bytes_accessed))

    out = pl.pallas_call(
        functools.partial(f_mnist_kernel, power),
        grid=(Bp // tb,),
        in_specs=[pl.BlockSpec((nz, tb), lambda i: (0, i))] + weight_specs,
        out_specs=pl.BlockSpec((1, tb), lambda i: (0, i)),
        out_shape=jax.ShapeDtypeStruct((1, Bp), jnp.float32),
        compiler_params=pltpu.CompilerParams(dimension_semantics=("parallel",)),
        cost_estimate=cost,
    )(xt, *weight_args)
    return out[0, :B]                                  # .squeeze(1)


def f_mnist_reference(x, params, power=POWER, eps=BN_EPS):
    """Pure-JAX reference matching the PyTorch module exactly (f32, unfused)."""
    h = jnp.concatenate([x ** i for i in range(power)], axis=1)
    for li in range(1, 5):
        h = h @ params[f"w{li}"].T + params[f"b{li}"]
        if li < 4:
            scale = params[f"gamma{li}"] / jnp.sqrt(params[f"var{li}"] + eps)
            shift = params[f"beta{li}"] - params[f"mean{li}"] * scale
            h = _leaky_relu(h * scale + shift)
    return jax.nn.sigmoid(h)[:, 0]


if __name__ == "__main__":
    key = jax.random.PRNGKey(0)
    k_x, k_p = jax.random.split(key)
    x = jax.random.normal(k_x, (BATCH, NZ), dtype=jnp.float32)
    params = init_params(k_p)
    folded = fold_params(params)

    out = jax.block_until_ready(f_mnist_forward(x, folded))
    ref = jax.block_until_ready(f_mnist_reference(x, params))

    assert out.shape == (BATCH,), out.shape
    # bf16 MXU operands vs f32 reference: loosened tolerance.
    assert jnp.allclose(out, ref, rtol=2e-2, atol=2e-2), (out, ref)
    print("KERNEL_OK")
</pallas_src>

<mosaic_0001>
module attributes {stable_mosaic.version = 11 : i64} {
  func.func @f_mnist_kernel(%arg0: i32, %arg1: memref<8x128xf32, #tpu.memory_space<vmem>>, %arg2: memref<64x40xbf16, #tpu.memory_space<vmem>>, %arg3: memref<64x1xf32, #tpu.memory_space<vmem>>, %arg4: memref<32x64xbf16, #tpu.memory_space<vmem>>, %arg5: memref<32x1xf32, #tpu.memory_space<vmem>>, %arg6: memref<16x32xbf16, #tpu.memory_space<vmem>>, %arg7: memref<16x1xf32, #tpu.memory_space<vmem>>, %arg8: memref<1x16xbf16, #tpu.memory_space<vmem>>, %arg9: memref<1x1xf32, #tpu.memory_space<vmem>>, %arg10: memref<1x128xf32, #tpu.memory_space<vmem>>) attributes {dimension_semantics = [#tpu.dimension_semantics<parallel>], iteration_bounds = array<i64: 1>, scalar_prefetch = 0 : i64, scratch_operands = 0 : i64, tpu.core_type = #tpu.core_type<tc>, window_params = [{transform_indices = @transform_0, window_bounds = array<i64: 8, 128>}, {pipeline_mode = #tpu.pipeline_mode<synchronous>, transform_indices = @transform_1, window_bounds = array<i64: 64, 40>}, {pipeline_mode = #tpu.pipeline_mode<synchronous>, transform_indices = @transform_2, window_bounds = array<i64: 64, 1>}, {pipeline_mode = #tpu.pipeline_mode<synchronous>, transform_indices = @transform_3, window_bounds = array<i64: 32, 64>}, {pipeline_mode = #tpu.pipeline_mode<synchronous>, transform_indices = @transform_4, window_bounds = array<i64: 32, 1>}, {pipeline_mode = #tpu.pipeline_mode<synchronous>, transform_indices = @transform_5, window_bounds = array<i64: 16, 32>}, {pipeline_mode = #tpu.pipeline_mode<synchronous>, transform_indices = @transform_6, window_bounds = array<i64: 16, 1>}, {pipeline_mode = #tpu.pipeline_mode<synchronous>, transform_indices = @transform_7, window_bounds = array<i64: 1, 16>}, {pipeline_mode = #tpu.pipeline_mode<synchronous>, transform_indices = @transform_8, window_bounds = array<i64: 1, 1>}, {transform_indices = @transform_9, window_bounds = array<i64: 1, 128>}]} {
    %c0 = arith.constant 0 : index
    %c0_0 = arith.constant 0 : index
    %0 = vector.load %arg1[%c0, %c0_0] : memref<8x128xf32, #tpu.memory_space<vmem>>, vector<8x128xf32>
    %1 = arith.mulf %0, %0 : vector<8x128xf32>
    %2 = arith.mulf %1, %0 : vector<8x128xf32>
    %3 = arith.mulf %2, %0 : vector<8x128xf32>
    %4 = arith.mulf %3, %0 : vector<8x128xf32>
    %5 = tpu.concatenate %0, %1, %2, %3, %4 in 0 : vector<8x128xf32>, vector<8x128xf32>, vector<8x128xf32>, vector<8x128xf32>, vector<8x128xf32> -> vector<40x128xf32>
    %6 = arith.truncf %5 : vector<40x128xf32> to vector<40x128xbf16>
    %c0_1 = arith.constant 0 : index
    %c0_2 = arith.constant 0 : index
    %7 = vector.load %arg2[%c0_1, %c0_2] : memref<64x40xbf16, #tpu.memory_space<vmem>>, vector<64x40xbf16>
    %cst = arith.constant dense<0.000000e+00> : vector<64x128xf32>
    %8 = tpu.matmul %7, %6, %cst {dimension_numbers = #tpu.dot_dimension_numbers<[1], [0], [0], [1], [0, 0, 1, 1], [], []>} : vector<64x40xbf16>, vector<40x128xbf16>, vector<64x128xf32> -> vector<64x128xf32>
    %c0_3 = arith.constant 0 : index
    %c0_4 = arith.constant 0 : index
    %9 = vector.load %arg3[%c0_3, %c0_4] : memref<64x1xf32, #tpu.memory_space<vmem>>, vector<64x1xf32>
    %10 = vector.broadcast %9 : vector<64x1xf32> to vector<64x128xf32>
    %11 = arith.addf %8, %10 : vector<64x128xf32>
    %cst_5 = arith.constant 0.000000e+00 : f32
    %12 = vector.broadcast %cst_5 : f32 to vector<64x128xf32>
    %13 = arith.cmpf ogt, %11, %12 : vector<64x128xf32>
    %cst_6 = arith.constant 1.000000e-01 : f32
    %14 = vector.broadcast %cst_6 : f32 to vector<64x128xf32>
    %15 = arith.mulf %14, %11 : vector<64x128xf32>
    %16 = arith.select %13, %11, %15 : vector<64x128xi1>, vector<64x128xf32>
    %c0_7 = arith.constant 0 : index
    %c0_8 = arith.constant 0 : index
    %17 = vector.load %arg4[%c0_7, %c0_8] : memref<32x64xbf16, #tpu.memory_space<vmem>>, vector<32x64xbf16>
    %18 = arith.truncf %16 : vector<64x128xf32> to vector<64x128xbf16>
    %cst_9 = arith.constant dense<0.000000e+00> : vector<32x128xf32>
    %19 = tpu.matmul %17, %18, %cst_9 {dimension_numbers = #tpu.dot_dimension_numbers<[1], [0], [0], [1], [0, 0, 1, 1], [], []>} : vector<32x64xbf16>, vector<64x128xbf16>, vector<32x128xf32> -> vector<32x128xf32>
    %c0_10 = arith.constant 0 : index
    %c0_11 = arith.constant 0 : index
    %20 = vector.load %arg5[%c0_10, %c0_11] : memref<32x1xf32, #tpu.memory_space<vmem>>, vector<32x1xf32>
    %21 = vector.broadcast %20 : vector<32x1xf32> to vector<32x128xf32>
    %22 = arith.addf %19, %21 : vector<32x128xf32>
    %cst_12 = arith.constant 0.000000e+00 : f32
    %23 = vector.broadcast %cst_12 : f32 to vector<32x128xf32>
    %24 = arith.cmpf ogt, %22, %23 : vector<32x128xf32>
    %cst_13 = arith.constant 1.000000e-01 : f32
    %25 = vector.broadcast %cst_13 : f32 to vector<32x128xf32>
    %26 = arith.mulf %25, %22 : vector<32x128xf32>
    %27 = arith.select %24, %22, %26 : vector<32x128xi1>, vector<32x128xf32>
    %c0_14 = arith.constant 0 : index
    %c0_15 = arith.constant 0 : index
    %28 = vector.load %arg6[%c0_14, %c0_15] : memref<16x32xbf16, #tpu.memory_space<vmem>>, vector<16x32xbf16>
    %29 = arith.truncf %27 : vector<32x128xf32> to vector<32x128xbf16>
    %cst_16 = arith.constant dense<0.000000e+00> : vector<16x128xf32>
    %30 = tpu.matmul %28, %29, %cst_16 {dimension_numbers = #tpu.dot_dimension_numbers<[1], [0], [0], [1], [0, 0, 1, 1], [], []>} : vector<16x32xbf16>, vector<32x128xbf16>, vector<16x128xf32> -> vector<16x128xf32>
    %c0_17 = arith.constant 0 : index
    %c0_18 = arith.constant 0 : index
    %31 = vector.load %arg7[%c0_17, %c0_18] : memref<16x1xf32, #tpu.memory_space<vmem>>, vector<16x1xf32>
    %32 = vector.broadcast %31 : vector<16x1xf32> to vector<16x128xf32>
    %33 = arith.addf %30, %32 : vector<16x128xf32>
    %cst_19 = arith.constant 0.000000e+00 : f32
    %34 = vector.broadcast %cst_19 : f32 to vector<16x128xf32>
    %35 = arith.cmpf ogt, %33, %34 : vector<16x128xf32>
    %cst_20 = arith.constant 1.000000e-01 : f32
    %36 = vector.broadcast %cst_20 : f32 to vector<16x128xf32>
    %37 = arith.mulf %36, %33 : vector<16x128xf32>
    %38 = arith.select %35, %33, %37 : vector<16x128xi1>, vector<16x128xf32>
    %c0_21 = arith.constant 0 : index
    %c0_22 = arith.constant 0 : index
    %39 = vector.load %arg8[%c0_21, %c0_22] : memref<1x16xbf16, #tpu.memory_space<vmem>>, vector<1x16xbf16>
    %40 = arith.truncf %38 : vector<16x128xf32> to vector<16x128xbf16>
    %cst_23 = arith.constant dense<0.000000e+00> : vector<1x128xf32>
    %41 = tpu.matmul %39, %40, %cst_23 {dimension_numbers = #tpu.dot_dimension_numbers<[1], [0], [0], [1], [0, 0, 1, 1], [], []>} : vector<1x16xbf16>, vector<16x128xbf16>, vector<1x128xf32> -> vector<1x128xf32>
    %c0_24 = arith.constant 0 : index
    %c0_25 = arith.constant 0 : index
    %42 = vector.load %arg9[%c0_24, %c0_25] : memref<1x1xf32, #tpu.memory_space<vmem>>, vector<1x1xf32>
    %43 = vector.broadcast %42 : vector<1x1xf32> to vector<1x128xf32>
    %44 = arith.addf %41, %43 : vector<1x128xf32>
    %45 = arith.negf %44 : vector<1x128xf32>
    %46 = math.exp %45 : vector<1x128xf32>
    %cst_26 = arith.constant 1.000000e+00 : f32
    %47 = vector.broadcast %cst_26 : f32 to vector<1x128xf32>
    %48 = arith.addf %47, %46 : vector<1x128xf32>
    %49 = arith.divf %47, %48 : vector<1x128xf32>
    %c0_27 = arith.constant 0 : index
    %c0_28 = arith.constant 0 : index
    %50 = vector.load %arg10[%c0_27, %c0_28] : memref<1x128xf32, #tpu.memory_space<vmem>>, vector<1x128xf32>
    tpu.vector_store %arg10[%c0_27, %c0_28], %49 {strides = array<i32>} : memref<1x128xf32, #tpu.memory_space<vmem>>, vector<1x128xf32>,
    return
  }
  func.func @transform_0(%arg0: i32) -> (i32, i32) {
    %c0_i32 = arith.constant 0 : i32
    %c0_i32_0 = arith.constant 0 : i32
    return %c0_i32, %arg0 : i32, i32
  }
  func.func @transform_1(%arg0: i32) -> (i32, i32) {
    %c0_i32 = arith.constant 0 : i32
    %c0_i32_0 = arith.constant 0 : i32
    %c0_i32_1 = arith.constant 0 : i32
    return %c0_i32, %c0_i32_0 : i32, i32
  }
  func.func @transform_2(%arg0: i32) -> (i32, i32) {
    %c0_i32 = arith.constant 0 : i32
    %c0_i32_0 = arith.constant 0 : i32
    %c0_i32_1 = arith.constant 0 : i32
    return %c0_i32, %c0_i32_0 : i32, i32
  }
  func.func @transform_3(%arg0: i32) -> (i32, i32) {
    %c0_i32 = arith.constant 0 : i32
    %c0_i32_0 = arith.constant 0 : i32
    %c0_i32_1 = arith.constant 0 : i32
    return %c0_i32, %c0_i32_0 : i32, i32
  }
  func.func @transform_4(%arg0: i32) -> (i32, i32) {
    %c0_i32 = arith.constant 0 : i32
    %c0_i32_0 = arith.constant 0 : i32
    %c0_i32_1 = arith.constant 0 : i32
    return %c0_i32, %c0_i32_0 : i32, i32
  }
  func.func @transform_5(%arg0: i32) -> (i32, i32) {
    %c0_i32 = arith.constant 0 : i32
    %c0_i32_0 = arith.constant 0 : i32
    %c0_i32_1 = arith.constant 0 : i32
    return %c0_i32, %c0_i32_0 : i32, i32
  }
  func.func @transform_6(%arg0: i32) -> (i32, i32) {
    %c0_i32 = arith.constant 0 : i32
    %c0_i32_0 = arith.constant 0 : i32
    %c0_i32_1 = arith.constant 0 : i32
    return %c0_i32, %c0_i32_0 : i32, i32
  }
  func.func @transform_7(%arg0: i32) -> (i32, i32) {
    %c0_i32 = arith.constant 0 : i32
    %c0_i32_0 = arith.constant 0 : i32
    %c0_i32_1 = arith.constant 0 : i32
    return %c0_i32, %c0_i32_0 : i32, i32
  }
  func.func @transform_8(%arg0: i32) -> (i32, i32) {
    %c0_i32 = arith.constant 0 : i32
    %c0_i32_0 = arith.constant 0 : i32
    %c0_i32_1 = arith.constant 0 : i32
    return %c0_i32, %c0_i32_0 : i32, i32
  }
  func.func @transform_9(%arg0: i32) -> (i32, i32) {
    %c0_i32 = arith.constant 0 : i32
    %c0_i32_0 = arith.constant 0 : i32
    return %c0_i32, %arg0 : i32, i32
  }
}

</mosaic_0001>

<bundles_post_ra>
// kernel: tpu_custom_call.1
= control target key start
LH: loop header
LB: loop body
LE: loop exit
PB: predicated region body
PF: predicated region fallthrough
CT: control target
= control target key end

     0   :  { %s745_s0 = inlined_call_operand.vmem [shape: f32[8,128], index: 0, kind: input, shape index: {}]   ;;  %s746_s1 = inlined_call_operand.vmem [shape: bf16[64,40], index: 1, kind: input, shape index: {}]   ;;  %s747_s2 = inlined_call_operand.vmem [shape: f32[64,1], index: 2, kind: input, shape index: {}]   ;;  %s748_s3 = inlined_call_operand.vmem [shape: bf16[32,64], index: 3, kind: input, shape index: {}]   ;;  %s749_s4 = inlined_call_operand.vmem [shape: f32[32,1], index: 4, kind: input, shape index: {}]   ;;  %s750_s5 = inlined_call_operand.vmem [shape: bf16[16,32], index: 5, kind: input, shape index: {}]   ;;  %s751_s6 = inlined_call_operand.vmem [shape: f32[16,1], index: 6, kind: input, shape index: {}]   ;;  %s752_s7 = inlined_call_operand.vmem [shape: bf16[1,16], index: 7, kind: input, shape index: {}]   ;;  %s753_s8 = inlined_call_operand.<no memory space> [shape: f32[1,1], index: 8, kind: input, shape index: {}]   ;;  %s754_s9 = inlined_call_operand.hbm [shape: f32[1,128], index: 9, kind: output, shape index: {}]  }
   0x1   :  { %v14_v0 = vstv %s753_s8 }
   0x2   :  { %15 = vst [vmem:[#allocation2] sm:$0x1] %v14_v0 }
   0x3   :  { %v36_v1 = vld [vmem:[%s745_s0] sm:$0xff]  ;;  %vm120_vm0 = vcmask 326656   ;;  %v601_v6 = vmov 0   ;;  %v54_v9 = vld [vmem:[%s747_s2 + $0x10] sm:$0xff]  ;;  %v53_v10 = vld [vmem:[%s747_s2 + $0x8] sm:$0xff]  ;;  %vm133_vm1 = vcmask 1043456  }
   0x4   :  { %v37_v2 = vmul.f32 %v36_v1, %v36_v1  ;;  %v566_v3 = vld [vmem:[%s746_s1] sm:$0xff]   ;;  %564 = vset.pattern.permute.xlu0 %v601_v6  ;;  %565 = vset.pattern.permute.xlu1 %v601_v6  ;;  %v55_v13 = vld [vmem:[%s747_s2 + $0x18] sm:$0xff]  ;;  %v57_v17 = vld [vmem:[%s747_s2 + $0x28] sm:$0xff] }
   0x5   :  { %525 = vmatprep.mubr.msk.bf16.mxu0 %vm120_vm0, %v566_v3  ;;  %v52_v7 = vld [vmem:[%s747_s2] sm:$0xff]  ;;  %72 = vperm.xlu1 %565, %v54_v9  }
   0x6   :  { %v38_v4 = vmul.f32 %v37_v2, %v36_v1  ;;  %v41_v5 = vpack.c.bf16 %v37_v2, %v36_v1  ;;  %62 = vperm.xlu0 %564, %v52_v7   ;;  %v56_v15 = vld [vmem:[%s747_s2 + $0x20] sm:$0xff] }
   0x8   :  { %519 = vmatprep.subr.bf16.mxu0 %v41_v5  ;;  %v39_v8 = vmul.f32 %v38_v4, %v36_v1 }
   0x9   :  { %520 = vmatpush3.bf16.msra.mxu0 %v41_v5  ;;  %77 = vperm.xlu1 %565, %v55_v13  }
   0xa   :  { %v42_v11 = vpack.c.bf16 %v39_v8, %v38_v4  ;;  %v40_v12 = vmul.f32 %v39_v8, %v36_v1  ;;  %67 = vperm.xlu0 %564, %v53_v10  }
   0xc   :  { %521 = vmatprep.subr.bf16.mxu0 %v42_v11  ;;  %v43_v14 = vpack.c.bf16 %v40_v12, %v40_v12 }
   0xd   :  { %522 = vmatpush3.bf16.msra.mxu0 %v42_v11 }
   0xe   :  { %559 = vmatprep.subr.msk.bf16.mxu0 %vm133_vm1, %v43_v14  ;;  %v135_v16 = vsel %vm133_vm1, %v43_v14, 0 }
   0xf   :  { %16 = vsyncpa [#allocation4], 0  ;;  %v567_v18 = vld [vmem:[%s746_s1 + $0x8] sm:$0xff]   ;;  %82 = vperm.xlu0 %564, %v56_v15   ;;  %v568_v19 = vld [vmem:[%s746_s1 + $0x10] sm:$0xff]   ;;  %87 = vperm.xlu1 %565, %v57_v17   ;;  %vm268_vm2 = vcmask 523264   ;;  %v602_v12 = vmov 0.0  }
  0x10   :  { %v58_v20 = vld [vmem:[%s747_s2 + $0x30] sm:$0xff]  ;;  %v59_v21 = vld [vmem:[%s747_s2 + $0x38] sm:$0xff]  ;;  %v234_v22 = vld [vmem:[%s749_s4] sm:$0xff]  ;;  %vm603_vm11 = vmmov 0   ;;  %s604_s26 = smov [#allocation3]  }
  0x11   :  { %524 = vmatpush3.bf16.msra.mxu0 %v135_v16  ;;  %v235_v23 = vld [vmem:[%s749_s4 + $0x8] sm:$0xff]  ;;  %v569_v24 = vld [vmem:[%s746_s1 + $0x18] sm:$0xff]   ;;  %v236_v25 = vld [vmem:[%s749_s4 + $0x10] sm:$0xff]  ;;  %s477_s27 = sshll.u32 %s604_s26, 4  ;;  %s478_s27 = int_to_ptr.vmem [resolvable:$true] %s477_s27 }
  0x12   :  { %v237_v26 = vld [vmem:[%s749_s4 + $0x18] sm:$0xff]  ;;  %v340_v27 = vld [vmem:[%s751_s6] sm:$0xff]  ;;  %v341_v28 = vld [vmem:[%s751_s6 + $0x8] sm:$0xff]  ;;  %553 = vmatprep.subr.bf16.mxu0 %v602_v12  ;;  %s581_s28 = scalar_lea.vmem %s478_s27, 32  ;;  %p582_p1 = scmp.lt.s32.totalorder %s478_s27, %s478_s27 }
  0x13   :  { %92 = vperm.xlu0 %564, %v58_v20   ;;  %97 = vperm.xlu1 %565, %v59_v21   ;;  %v410_v29 = vld [vmem:[#allocation2] sm:$0x1]  ;;  %v571_v11 = vld [vmem:[%s748_s3 + $0x8] sm:$0xff]  }
  0x14   :  { %526 = vmatmul.mubr.msk.bf16.vlgmr.msra.gmra.mrb[0].mxu0 %vm120_vm0, %v567_v18  ;;  %v570_v30 = vld [vmem:[%s748_s3] sm:$0xff]  }
  0x15   :  { %529 = vmatprep.mubr.msk.bf16.mxu0 %vm120_vm0, %v568_v19  ;;  %541 = vmatprep.mubr.msk.bf16.mxu1 %vm268_vm2, %v570_v30 }
  0x17   :  { %240 = vperm.xlu0 %564, %v234_v22   ;;  %245 = vperm.xlu1 %565, %v235_v23  }
  0x1b   :  { %250 = vperm.xlu0 %564, %v236_v25   ;;  %255 = vperm.xlu1 %565, %v237_v26  }
  0x1c   :  { %530 = vmatmul.mubr.msk.bf16.gmra.mrb[4].mxu0 %vm120_vm0, %v569_v24  ;;  %vm357_vm0 = vcmask 261120  }
  0x1d   :  { %555 = vmatprep.mubr.msk.bf16.mxu0 %vm603_vm11, %v602_v12 }
  0x1f   :  { %344 = vperm.xlu0 %564, %v340_v27   ;;  %349 = vperm.xlu1 %565, %v341_v28  }
  0x23   :  { %413 = vperm.xlu0 %564, %v410_v29  }
  0x84   :  { %v73_v32 = vpop.permute.xlu1 %72 }
  0x85   :  { %v63_v31 = vpop.permute.xlu0 %62 }
  0x88   :  { %v78_v34 = vpop.permute.xlu1 %77 }
  0x89   :  { %v68_v33 = vpop.permute.xlu0 %67 }
  0x8e   :  { %v83_v38 = vpop.permute.xlu0 %82  ;;  %v88_v44 = vpop.permute.xlu1 %87 }
  0x92   :  { %v93_v51 = vpop.permute.xlu0 %92  ;;  %v98_v59 = vpop.permute.xlu1 %97 }
  0x96   :  { %v241_v13 = vpop.permute.xlu0 %240  ;;  %v246_v14 = vpop.permute.xlu1 %245 }
  0x9a   :  { %v251_v15 = vpop.permute.xlu0 %250  ;;  %v256_v19 = vpop.permute.xlu1 %255 }
  0xe7   :  { %v527_v35 = vpop.f32.mrb[0].mxu0 }
  0xe8   :  { %v180_v36 = vadd.f32 %v527_v35, %v73_v32  ;;  %v171_v37 = vpop.f32.mrb[1].mxu0  ;;  %v572_v35 = vld [vmem:[%s750_s5] sm:$0xff]  }
  0xe9   :  { %v172_v39 = vadd.f32 %v171_v37, %v63_v31  ;;  %v528_v40 = vpop.f32.mrb[2].mxu0 }
  0xea   :  { %v212_v41 = vmul.f32 0.1, %v180_v36  ;;  %v183_v42 = vadd.f32 %v528_v40, %v78_v34  ;;  %v174_v43 = vpop.f32.mrb[3].mxu0  ;;  %vm204_vm3 = vcmp.gt.f32.partialorder %v180_v36, 0.0  ;;  %v350_v40 = vpop.permute.xlu1 %349 }
  0xeb   :  { %v210_v45 = vmul.f32 0.1, %v172_v39  ;;  %v175_v46 = vadd.f32 %v174_v43, %v68_v33  ;;  %vm202_vm5 = vcmp.gt.f32.partialorder %v172_v39, 0.0 }
  0xec   :  { %vm205_vm4 = vcmp.gt.f32.partialorder %v183_v42, 0.0  ;;  %v213_v47 = vmul.f32 0.1, %v183_v42  ;;  %v220_v49 = vsel %vm204_vm3, %v180_v36, %v212_v41  ;;  %v345_v36 = vpop.permute.xlu0 %344  ;;  %vm420_vm3 = vcmask 130048  }
  0xed   :  { %v211_v48 = vmul.f32 0.1, %v175_v46  ;;  %vm203_vm6 = vcmp.gt.f32.partialorder %v175_v46, 0.0  ;;  %v218_v53 = vsel %vm202_vm5, %v172_v39, %v210_v45 }
  0xee   :  { %v221_v50 = vsel %vm205_vm4, %v183_v42, %v213_v47 }
  0xef   :  { %v531_v52 = vpop.f32.mrb[4].mxu0  ;;  %v219_v54 = vsel %vm203_vm6, %v175_v46, %v211_v48  ;;  %v231_v55 = vpack.c.bf16 %v221_v50, %v220_v49  ;;  %v408_v49 = vld [vmem:[%s752_s7] sm:$0x1]  ;;  %v416_v50 = vlaneseq  ;;  %s577_s7 = scalar_lea.vmem %s478_s27, 16 }
  0xf0   :  { %v196_v56 = vadd.f32 %v531_v52, %v93_v51  ;;  %v187_v57 = vpop.f32.mrb[5].mxu0  ;;  %v230_v58 = vpack.c.bf16 %v219_v54, %v218_v53  ;;  %v414_v53 = vpop.permute.xlu0 %413  ;;  %p578_p0 = scmp.ne.s32.totalorder %s478_s27, %s577_s7  ;;  %p583_p2 = scmp.lt.s32.totalorder %s581_s28, %s577_s7 }
  0xf1   :  { %v188_v60 = vadd.f32 %v187_v57, %v83_v38  ;;  %v532_v61 = vpop.f32.mrb[6].mxu0  ;;  %v417_v51 = vshrl.u32 %v416_v50, 7 }
  0xf2   :  { %v216_v62 = vmul.f32 0.1, %v196_v56  ;;  %v199_v63 = vadd.f32 %v532_v61, %v98_v59  ;;  %v190_v0 = vpop.f32.mrb[7].mxu0  ;;  %533 = vmatprep.subr.bf16.mxu1 %v230_v58  ;;  %vm208_vm7 = vcmp.gt.f32.partialorder %v196_v56, 0.0  ;;  %p584_p3 = por %p583_p2, %p582_p1 }
  0xf3   :  { %v214_v1 = vmul.f32 0.1, %v188_v60  ;;  %v191_v2 = vadd.f32 %v190_v0, %v88_v44  ;;  %534 = vmatpush3.bf16.msra.mxu1 %v230_v58  ;;  %vm206_vm8 = vcmp.gt.f32.partialorder %v188_v60, 0.0  ;;  %v418_v52 = vsub.s32 0, %v417_v51 }
  0xf4   :  { %vm209_vm9 = vcmp.gt.f32.partialorder %v199_v63, 0.0  ;;  %v217_v3 = vmul.f32 0.1, %v199_v63  ;;  %535 = vmatprep.subr.bf16.mxu1 %v231_v55  ;;  %v224_v5 = vsel %vm208_vm7, %v196_v56, %v216_v62  ;;  %p585_p4 = pnand %p584_p3, %p578_p0 }
  0xf5   :  { %vm207_vm10 = vcmp.gt.f32.partialorder %v191_v2, 0.0  ;;  %v215_v4 = vmul.f32 0.1, %v191_v2  ;;  %v222_v7 = vsel %vm206_vm8, %v188_v60, %v214_v1  ;;  %v419_v54 = vrot.slane %v414_v53, %v418_v52 }
  0xf6   :  { %v225_v6 = vsel %vm209_vm9, %v199_v63, %v217_v3 }
  0xf7   :  { %536 = vmatpush3.bf16.msra.mxu1 %v231_v55  ;;  %v223_v8 = vsel %vm207_vm10, %v191_v2, %v215_v4  ;;  %v233_v9 = vpack.c.bf16 %v225_v6, %v224_v5 }
  0xf8   :  { %v232_v10 = vpack.c.bf16 %v223_v8, %v222_v7 }
  0xfa   :  { %537 = vmatprep.subr.bf16.mxu1 %v232_v10 }
  0xfb   :  { %538 = vmatpush3.bf16.msra.mxu1 %v232_v10 }
  0xfc   :  { %539 = vmatprep.subr.bf16.mxu1 %v233_v9 }
  0xff   :  { %540 = vmatpush3.bf16.msra.mxu1 %v233_v9 }
 0x100   :  { %545 = vmatprep.subr.bf16.mxu1 %v602_v12 }
 0x102   :  { %542 = vmatmul.mubr.msk.bf16.vlgmr.msra.gmra.mrb[0].mxu1 %vm268_vm2, %v571_v11 }
 0x103   :  { %549 = vmatprep.mubr.msk.bf16.mxu1 %vm603_vm11, %v602_v12 }
 0x1d5   :  { %v543_v16 = vpop.f32.mrb[0].mxu1 }
 0x1d6   :  { %v318_v17 = vadd.f32 %v543_v16, %v251_v15  ;;  %v309_v18 = vpop.f32.mrb[1].mxu1 }
 0x1d7   :  { %v310_v20 = vadd.f32 %v309_v18, %v241_v13  ;;  %v544_v21 = vpop.f32.mrb[2].mxu1 }
 0x1d8   :  { %v330_v22 = vmul.f32 0.1, %v318_v17  ;;  %v321_v23 = vadd.f32 %v544_v21, %v256_v19  ;;  %v312_v24 = vpop.f32.mrb[3].mxu1  ;;  %vm326_vm12 = vcmp.gt.f32.partialorder %v318_v17, 0.0 }
 0x1d9   :  { %v328_v25 = vmul.f32 0.1, %v310_v20  ;;  %v313_v26 = vadd.f32 %v312_v24, %v246_v14  ;;  %vm324_vm13 = vcmp.gt.f32.partialorder %v310_v20, 0.0 }
 0x1da   :  { %vm327_vm14 = vcmp.gt.f32.partialorder %v321_v23, 0.0  ;;  %v331_v27 = vmul.f32 0.1, %v321_v23  ;;  %v334_v29 = vsel %vm326_vm12, %v318_v17, %v330_v22 }
 0x1db   :  { %vm325_vm15 = vcmp.gt.f32.partialorder %v313_v26, 0.0  ;;  %v329_v28 = vmul.f32 0.1, %v313_v26  ;;  %v332_v31 = vsel %vm324_vm13, %v310_v20, %v328_v25 }
 0x1dc   :  { %v335_v30 = vsel %vm327_vm14, %v321_v23, %v331_v27 }
 0x1dd   :  { %v339_v32 = vpack.c.bf16 %v335_v30, %v334_v29  ;;  %v333_v33 = vsel %vm325_vm15, %v313_v26, %v329_v28 }
 0x1de   :  { %v338_v34 = vpack.c.bf16 %v333_v33, %v332_v31 }
 0x1e0   :  { %546 = vmatpush3.bf16.msra.mxu1 %v338_v34 }
 0x1e1   :  { %547 = vmatprep.subr.bf16.mxu1 %v602_v12 }
 0x1e4   :  { %548 = vmatpush3.bf16.msra.mxu1 %v339_v32 }
 0x1e7   :  { %550 = vmatmul.mubr.msk.bf16.vlgmr.msra.gmra.mrb[4].mxu1 %vm357_vm0, %v572_v35 }
 0x2ba   :  { %v395_v37 = vpop.f32.mrb[4].mxu1 }
 0x2bb   :  { %v396_v38 = vadd.f32 %v395_v37, %v345_v36  ;;  %v551_v39 = vpop.f32.mrb[5].mxu1 }
 0x2bc   :  { %v398_v41 = vpop.f32.mrb[6].mxu1 }
 0x2bd   :  { %v404_v42 = vmul.f32 0.1, %v396_v38  ;;  %v399_v43 = vadd.f32 %v398_v41, %v350_v40  ;;  %v552_v44 = vpop.f32.mrb[7].mxu1  ;;  %vm402_vm1 = vcmp.gt.f32.partialorder %v396_v38, 0.0 }
 0x2bf   :  { %vm403_vm2 = vcmp.gt.f32.partialorder %v399_v43, 0.0  ;;  %v405_v45 = vmul.f32 0.1, %v399_v43  ;;  %v406_v46 = vsel %vm402_vm1, %v396_v38, %v404_v42 }
 0x2c1   :  { %v407_v47 = vsel %vm403_vm2, %v399_v43, %v405_v45 }
 0x2c2   :  { %v409_v48 = vpack.c.bf16 %v407_v47, %v406_v46 }
 0x2c4   :  { %554 = vmatpush3.bf16.msra.mxu0 %v409_v48 }
 0x2c7   :  { %556 = vmatmul.mubr.msk.bf16.vlgmr.msra.gmra.mrb[8].mxu0 %vm420_vm3, %v408_v49 }
 0x39a   :  { %v458_v55 = vpop.f32.mrb[8].mxu0 }
 0x39b   :  { %v459_v56 = vadd.f32 %v458_v55, %v419_v54  ;;  %v557_v57 = vpop.f32.mrb[9].mxu0 }
 0x39c   :  { %v461_v58 = vpop.f32.mrb[10].mxu0 }
 0x39d   :  { %v500_v59 = vmul.f32 -1.442695, %v459_v56  ;;  %v558_v60 = vpop.f32.mrb[11].mxu0 }
 0x39f   :  { %573 = vpow2.f32 %v500_v59 }
 0x3a9   :  { %v574_v61 = vpop.eup %573 }
 0x3aa   :  { %v467_v62 = vadd.f32 1.0, %v574_v61 }
 0x3ac   :  { %575 = vrcp.f32 %v467_v62 }
 0x3b6   :  { %v576_v63 = vpop.eup %575 }
 0x3b7   :  { %470 = vst [vmem:[#allocation3] sm:$0x1] %v576_v63 }
 0x3b8   :  { %588 = shalt.err (!%p585_p4)
}
 0x3b9   :  { %s589_s10 = scalar_lea.hbm %s754_s9, 16 }
 0x3ba   :  { %p590_p5 = scmp.ne.s32.totalorder %s754_s9, %s589_s10  ;;  %p593_p6 = scmp.lt.u32.totalorder %s589_s10, %s754_s9 }
 0x3bc   :  { %p595_p7 = pnand %p593_p6, %p590_p5 }
 0x3be   :  { %598 = shalt.err (!%p595_p7)
}
 0x3bf   :  { %480 = dma.vmem_to_hbm [thread:$0]  %s478_s27, 16, %s754_s9, [#allocation4]  }
 0x3c0   :  { %599 = dma.done.wait [#allocation4], 16  }
 0x3c1   :  { %600 = vsyncadd [#allocation4], 4294967280 }
 0x3c2   :  { %484 = vsyncpa [#allocation4], 1 }

</bundles_post_ra>
